<compile_context>
chip_gen: v7x
topology: tpu7x:2x2x1
jax: 0.10.0
libtpu: 0.0.40
codegen_flags: <defaults>
</compile_context>

<pallas_src>
import functools

import jax
import jax.numpy as jnp
import numpy as np
from jax.experimental import pallas as pl
from jax.experimental.pallas import tpu as pltpu

LANE = 128


def _round_up(x, m):
    return ((x + m - 1) // m) * m


# ----------------------------- Pallas kernels -----------------------------

def linear_kernel(x_ref, w_ref, b_ref, o_ref, *, apply_relu):
    y = jnp.dot(x_ref[...], w_ref[...], preferred_element_type=jnp.float32)
    y = y + b_ref[...]                      # b is (1, fp) -> broadcasts over rows
    if apply_relu:
        y = jnp.maximum(y, 0.0)
    o_ref[...] = y


def linear(x, w, b, *, apply_relu):
    """y = x @ w + b (optional ReLU). Gridded over row tiles; output columns are
    padded to a multiple of 128 lanes (padded cols are exactly zero)."""
    n, f_in = x.shape
    f_out = w.shape[1]
    fp = _round_up(f_out, LANE)
    tm = 256 if n > 256 else _round_up(max(n, 8), 8)
    n_pad = _round_up(n, tm)

    x_p = jnp.pad(x, ((0, n_pad - n), (0, 0)))
    w_p = jnp.pad(w, ((0, 0), (0, fp - f_out)))
    b_p = jnp.pad(jnp.reshape(b, (1, -1)), ((0, 0), (0, fp - f_out)))

    out = pl.pallas_call(
        functools.partial(linear_kernel, apply_relu=apply_relu),
        out_shape=jax.ShapeDtypeStruct((n_pad, fp), jnp.float32),
        grid_spec=pltpu.PrefetchScalarGridSpec(
            num_scalar_prefetch=0,
            grid=(n_pad // tm,),
            in_specs=[
                pl.BlockSpec((tm, f_in), lambda i: (i, 0)),
                pl.BlockSpec((f_in, fp), lambda i: (0, 0)),
                pl.BlockSpec((1, fp), lambda i: (0, 0)),
            ],
            out_specs=pl.BlockSpec((tm, fp), lambda i: (i, 0)),
        ),
        compiler_params=pltpu.CompilerParams(
            dimension_semantics=("parallel",)),
    )(x_p, w_p, b_p)
    return out[:n]                          # keep padded (lane-dense) feature cols


def rgcn_layer_kernel(x_ref, root_ref, a_ref, y_ref, o_ref, *, apply_relu):
    r = pl.program_id(1)

    @pl.when(r == 0)
    def _():
        # self / root transform, once per row tile (not once per relation)
        o_ref[...] = jnp.dot(x_ref[...], root_ref[...],
                             preferred_element_type=jnp.float32)

    # hot path: bf16 A_r row-tile @ bf16 Y_r, f32 accumulation into the
    # resident output block (same output block index for every r)
    o_ref[...] += jnp.dot(a_ref[...], y_ref[...],
                          preferred_element_type=jnp.float32)

    if apply_relu:
        @pl.when(r == pl.num_programs(1) - 1)
        def _():
            o_ref[...] = jnp.maximum(o_ref[...], 0.0)


def rgcn_layer(a, x, basis, comp, root, *, apply_relu):
    """One RGCNConv layer on padded inputs.

    a:     [R, Np, Np] bf16 mean-normalized dense adjacency (zero padded)
    x:     [Np, Hp]    f32 node features (padded rows/cols are zero)
    basis: [B, Hp, Fp] f32 basis weights (zero padded)
    comp:  [R, B]      f32 basis coefficients
    root:  [Hp, Fp]    f32 root/self weight (zero padded)
    returns [Np, Fp] f32
    """
    R, Np, _ = a.shape
    Hp = x.shape[1]
    Fp = root.shape[1]
    tm = 256 if Np % 256 == 0 else 128      # MXU-friendly row tile, divides Np

    # basis trick hoisted out of the N^2 loop: num_bases feature transforms, then
    # a per-relation mix; streamed into the kernel as bf16.
    yb = jnp.einsum("nh,bho->bno", x, basis)                 # [B, Np, Fp]
    y = jnp.einsum("rb,bno->rno", comp, yb).astype(jnp.bfloat16)
    a = a.astype(jnp.bfloat16)

    kernel = functools.partial(rgcn_layer_kernel, apply_relu=apply_relu)
    return pl.pallas_call(
        kernel,
        out_shape=jax.ShapeDtypeStruct((Np, Fp), jnp.float32),
        grid_spec=pltpu.PrefetchScalarGridSpec(
            num_scalar_prefetch=0,
            grid=(Np // tm, R),             # row tiles (parallel), relations (reduction)
            in_specs=[
                pl.BlockSpec((tm, Hp), lambda i, r: (i, 0)),           # X row tile
                pl.BlockSpec((Hp, Fp), lambda i, r: (0, 0)),           # root (resident)
                pl.BlockSpec((None, tm, Np), lambda i, r: (r, i, 0)),  # A_r row tile
                pl.BlockSpec((None, Np, Fp), lambda i, r: (r, 0, 0)),  # Y_r
            ],
            out_specs=pl.BlockSpec((tm, Fp), lambda i, r: (i, 0)),     # resident acc
        ),
        compiler_params=pltpu.CompilerParams(
            dimension_semantics=("parallel", "arbitrary"),
            vmem_limit_bytes=48 * 1024 * 1024),
    )(x, root, a, y)


# ------------------------------- glue (JAX) --------------------------------

def build_dense_adj(edge_index, edge_type, num_nodes, num_relations):
    """A[r, i, j] = 1/deg_r(i) for edge j->i with relation r (mean aggregation)."""
    # TODO(synk): for production graph sizes replace the dense [R, N, N] adjacency
    # with a CSR / scalar-prefetch formulation (or per-(relation, row-tile) block
    # skipping); dense A streams mostly zeros.
    src, dst = edge_index[0], edge_index[1]
    A = jnp.zeros((num_relations, num_nodes, num_nodes), jnp.float32)
    A = A.at[edge_type, dst, src].add(1.0)
    deg = A.sum(axis=2, keepdims=True)
    return A / jnp.maximum(deg, 1.0)


def _pad_conv(conv, Hp, Fp):
    basis = conv["basis"]                   # [B, f_in, f_out]
    root = conv["root"]                     # [f_in, f_out]
    _, f_in, f_out = basis.shape
    basis_p = jnp.pad(basis, ((0, 0), (0, Hp - f_in), (0, Fp - f_out)))
    root_p = jnp.pad(root, ((0, Hp - f_in), (0, Fp - f_out)))
    return basis_p, root_p


def _forward(x_dict, edge_index, edge_type, params, node_types, num_relations,
             linear_fn, layer_fn):
    convs = params["convs"]
    hidden = convs[0]["root"].shape[0]
    out_dim = convs[-1]["root"].shape[1]
    Hp = _round_up(hidden, LANE)
    Fp_last = _round_up(out_dim, LANE)

    # 1) per-node-type projection + ReLU, concat in node_types order
    xs = [linear_fn(x_dict[nt], *params["proj"][nt], apply_relu=True)
          for nt in node_types]
    x = jnp.concatenate(xs, axis=0)                         # [N, Hp]
    N = x.shape[0]
    Np = 128 if N <= 128 else _round_up(N, 256)
    x = jnp.pad(x, ((0, Np - N), (0, 0)))                   # padded rows exactly zero

    # 2) dense mean-normalized adjacency, padded and cast once to bf16 (streamed)
    A = build_dense_adj(edge_index, edge_type, N, num_relations)
    A = jnp.pad(A, ((0, 0), (0, Np - N), (0, Np - N))).astype(jnp.bfloat16)

    # 3) RGCN layers with residuals
    x_latents = []
    for i, conv in enumerate(convs[:-1]):
        basis_p, root_p = _pad_conv(conv, Hp, Hp)
        x_ = layer_fn(A, x, basis_p, conv["comp"], root_p, apply_relu=True)
        x_latents.append(x[:N, :hidden])
        x = x_ if i == 0 else x + x_
    basis_p, root_p = _pad_conv(convs[-1], Hp, Fp_last)
    out = layer_fn(A, x, basis_p, convs[-1]["comp"], root_p, apply_relu=False)
    return out[:N, :out_dim], x_latents


def res_rgcn_forward(x_dict, edge_index, edge_type, params, node_types, num_relations):
    return _forward(x_dict, edge_index, edge_type, params, node_types, num_relations,
                    linear, rgcn_layer)


# ----------------------- references (plain JAX, no Pallas) ------------------

def _linear_ref(x, w, b, *, apply_relu):
    f_out = w.shape[1]
    fp = _round_up(f_out, LANE)
    w_p = jnp.pad(w, ((0, 0), (0, fp - f_out)))
    b_p = jnp.pad(jnp.reshape(b, (1, -1)), ((0, 0), (0, fp - f_out)))
    y = x @ w_p + b_p
    return jnp.maximum(y, 0.0) if apply_relu else y


def _rgcn_layer_ref(a, x, basis, comp, root, *, apply_relu):
    yb = jnp.einsum("nh,bho->bno", x, basis)
    y = jnp.einsum("rb,bno->rno", comp, yb).astype(jnp.bfloat16)
    a = a.astype(jnp.bfloat16)
    out = x @ root
    for r in range(a.shape[0]):
        out = out + jnp.dot(a[r], y[r], preferred_element_type=jnp.float32)
    return jnp.maximum(out, 0.0) if apply_relu else out


def res_rgcn_reference_bf16(x_dict, edge_index, edge_type, params, node_types,
                            num_relations):
    """Mirrors the Pallas path exactly (same padding / reassociation / bf16 casts)."""
    return _forward(x_dict, edge_index, edge_type, params, node_types, num_relations,
                    _linear_ref, _rgcn_layer_ref)


def res_rgcn_reference_f32(x_dict, edge_index, edge_type, params, node_types,
                           num_relations):
    """Original (un-reassociated) full-f32 formulation, for a semantic sanity check."""
    xs = [jnp.maximum(x_dict[nt] @ params["proj"][nt][0] + params["proj"][nt][1], 0.0)
          for nt in node_types]
    x = jnp.concatenate(xs, axis=0)
    N = x.shape[0]
    A = build_dense_adj(edge_index, edge_type, N, num_relations)

    def layer(x, conv):
        W = jnp.einsum("rb,bio->rio", conv["comp"], conv["basis"])
        out = x @ conv["root"]
        for r in range(num_relations):
            out = out + (A[r] @ x) @ W[r]
        return out

    x_latents = []
    convs = params["convs"]
    for i, conv in enumerate(convs[:-1]):
        x_ = jnp.maximum(layer(x, conv), 0.0)
        x_latents.append(x)
        x = x_ if i == 0 else x + x_
    out = layer(x, convs[-1])
    return out, x_latents


# ------------------------------ param setup --------------------------------

def init_params(key, node_in_dims, hidden_dim, out_dim, num_relations, num_bases,
                num_layers):
    params = {"proj": {}, "convs": []}
    for nt, in_dim in node_in_dims.items():
        key, k1, k2 = jax.random.split(key, 3)
        params["proj"][nt] = (
            jax.random.normal(k1, (in_dim, hidden_dim), jnp.float32) * 0.1,
            jax.random.normal(k2, (1, hidden_dim), jnp.float32) * 0.1,
        )
    dims = [(hidden_dim, hidden_dim)] * (num_layers - 1) + [(hidden_dim, out_dim)]
    for (f_in, f_out) in dims:
        key, k1, k2, k3 = jax.random.split(key, 4)
        params["convs"].append({
            "basis": jax.random.normal(k1, (num_bases, f_in, f_out), jnp.float32) * 0.1,
            "comp":  jax.random.normal(k2, (num_relations, num_bases), jnp.float32) * 0.1,
            "root":  jax.random.normal(k3, (f_in, f_out), jnp.float32) * 0.1,
        })
    return params


# ---------------------------------- main ------------------------------------

if __name__ == "__main__":
    key = jax.random.PRNGKey(0)

    node_types = ("paper", "author")
    node_in_dims = {"paper": 12, "author": 9}
    node_counts = {"paper": 10, "author": 6}
    hidden_dim, out_dim = 32, 16
    num_relations = 3          # len(edge_types)
    num_bases = 2
    num_layers = 3
    num_edges = 40
    N = sum(node_counts.values())

    key, kx1, kx2, ke1, ke2, ke3, kp = jax.random.split(key, 7)
    x_dict = {
        "paper":  jax.random.normal(kx1, (node_counts["paper"], node_in_dims["paper"]),
                                    jnp.float32),
        "author": jax.random.normal(kx2, (node_counts["author"], node_in_dims["author"]),
                                    jnp.float32),
    }
    src = jax.random.randint(ke1, (num_edges,), 0, N, jnp.int32)
    dst = jax.random.randint(ke2, (num_edges,), 0, N, jnp.int32)
    edge_index = jnp.stack([src, dst], axis=0)                  # [2, E]
    edge_type = jax.random.randint(ke3, (num_edges,), 0, num_relations, jnp.int32)

    params = init_params(kp, node_in_dims, hidden_dim, out_dim, num_relations,
                         num_bases, num_layers)

    fwd = jax.jit(functools.partial(res_rgcn_forward,
                                    node_types=node_types,
                                    num_relations=num_relations))
    out, x_latents = fwd(x_dict, edge_index, edge_type, params)
    out = jax.block_until_ready(out)
    x_latents = [jax.block_until_ready(t) for t in x_latents]

    # tight check: plain-JAX path with identical math / padding / bf16 casts
    ref_out, ref_lat = res_rgcn_reference_bf16(x_dict, edge_index, edge_type, params,
                                               node_types, num_relations)
    np.testing.assert_allclose(np.asarray(out), np.asarray(ref_out),
                               rtol=1e-4, atol=1e-4)
    for got, want in zip(x_latents, ref_lat):
        np.testing.assert_allclose(np.asarray(got), np.asarray(want),
                                   rtol=1e-4, atol=1e-4)

    # loose semantic check vs. the original full-f32 formulation (bf16 A/Y tolerance)
    f32_out, f32_lat = res_rgcn_reference_f32(x_dict, edge_index, edge_type, params,
                                              node_types, num_relations)
    np.testing.assert_allclose(np.asarray(out), np.asarray(f32_out),
                               rtol=5e-2, atol=2e-2)
    for got, want in zip(x_latents, f32_lat):
        np.testing.assert_allclose(np.asarray(got), np.asarray(want),
                                   rtol=5e-2, atol=2e-2)

    assert out.shape == (N, out_dim) and len(x_latents) == num_layers - 1
    print("KERNEL_OK")
</pallas_src>

<mosaic_0001>
module attributes {stable_mosaic.version = 11 : i64} {
  func.func @linear_kernel(%arg0: i32, %arg1: memref<16x12xf32, #tpu.memory_space<vmem>>, %arg2: memref<12x128xf32, #tpu.memory_space<vmem>>, %arg3: memref<1x128xf32, #tpu.memory_space<vmem>>, %arg4: memref<16x128xf32, #tpu.memory_space<vmem>>) attributes {dimension_semantics = [#tpu.dimension_semantics<parallel>], iteration_bounds = array<i64: 1>, scalar_prefetch = 0 : i64, scratch_operands = 0 : i64, tpu.core_type = #tpu.core_type<tc>, window_params = [{transform_indices = @transform_0, window_bounds = array<i64: 16, 12>}, {pipeline_mode = #tpu.pipeline_mode<synchronous>, transform_indices = @transform_1, window_bounds = array<i64: 12, 128>}, {pipeline_mode = #tpu.pipeline_mode<synchronous>, transform_indices = @transform_2, window_bounds = array<i64: 1, 128>}, {transform_indices = @transform_3, window_bounds = array<i64: 16, 128>}]} {
    %c0 = arith.constant 0 : index
    %c0_0 = arith.constant 0 : index
    %0 = vector.load %arg1[%c0, %c0_0] : memref<16x12xf32, #tpu.memory_space<vmem>>, vector<16x12xf32>
    %c0_1 = arith.constant 0 : index
    %c0_2 = arith.constant 0 : index
    %1 = vector.load %arg2[%c0_1, %c0_2] : memref<12x128xf32, #tpu.memory_space<vmem>>, vector<12x128xf32>
    %cst = arith.constant dense<0.000000e+00> : vector<16x128xf32>
    %2 = tpu.matmul %0, %1, %cst {dimension_numbers = #tpu.dot_dimension_numbers<[1], [0], [0], [1], [0, 0, 1, 1], [], []>} : vector<16x12xf32>, vector<12x128xf32>, vector<16x128xf32> -> vector<16x128xf32>
    %c0_3 = arith.constant 0 : index
    %c0_4 = arith.constant 0 : index
    %3 = vector.load %arg3[%c0_3, %c0_4] : memref<1x128xf32, #tpu.memory_space<vmem>>, vector<1x128xf32>
    %4 = vector.broadcast %3 : vector<1x128xf32> to vector<16x128xf32>
    %5 = arith.addf %2, %4 : vector<16x128xf32>
    %cst_5 = arith.constant 0.000000e+00 : f32
    %6 = vector.broadcast %cst_5 : f32 to vector<16x128xf32>
    %7 = arith.maximumf %5, %6 : vector<16x128xf32>
    %c0_6 = arith.constant 0 : index
    %c0_7 = arith.constant 0 : index
    %8 = vector.load %arg4[%c0_6, %c0_7] : memref<16x128xf32, #tpu.memory_space<vmem>>, vector<16x128xf32>
    tpu.vector_store %arg4[%c0_6, %c0_7], %7 {strides = array<i32>} : memref<16x128xf32, #tpu.memory_space<vmem>>, vector<16x128xf32>,
    return
  }
  func.func @transform_0(%arg0: i32) -> (i32, i32) {
    %c0_i32 = arith.constant 0 : i32
    %c0_i32_0 = arith.constant 0 : i32
    return %arg0, %c0_i32 : i32, i32
  }
  func.func @transform_1(%arg0: i32) -> (i32, i32) {
    %c0_i32 = arith.constant 0 : i32
    %c0_i32_0 = arith.constant 0 : i32
    %c0_i32_1 = arith.constant 0 : i32
    return %c0_i32, %c0_i32_0 : i32, i32
  }
  func.func @transform_2(%arg0: i32) -> (i32, i32) {
    %c0_i32 = arith.constant 0 : i32
    %c0_i32_0 = arith.constant 0 : i32
    %c0_i32_1 = arith.constant 0 : i32
    return %c0_i32, %c0_i32_0 : i32, i32
  }
  func.func @transform_3(%arg0: i32) -> (i32, i32) {
    %c0_i32 = arith.constant 0 : i32
    %c0_i32_0 = arith.constant 0 : i32
    return %arg0, %c0_i32 : i32, i32
  }
}

module attributes {stable_mosaic.version = 11 : i64} {
  func.func @linear_kernel(%arg0: i32, %arg1: memref<8x9xf32, #tpu.memory_space<vmem>>, %arg2: memref<9x128xf32, #tpu.memory_space<vmem>>, %arg3: memref<1x128xf32, #tpu.memory_space<vmem>>, %arg4: memref<8x128xf32, #tpu.memory_space<vmem>>) attributes {dimension_semantics = [#tpu.dimension_semantics<parallel>], iteration_bounds = array<i64: 1>, scalar_prefetch = 0 : i64, scratch_operands = 0 : i64, tpu.core_type = #tpu.core_type<tc>, window_params = [{transform_indices = @transform_0, window_bounds = array<i64: 8, 9>}, {pipeline_mode = #tpu.pipeline_mode<synchronous>, transform_indices = @transform_1, window_bounds = array<i64: 9, 128>}, {pipeline_mode = #tpu.pipeline_mode<synchronous>, transform_indices = @transform_2, window_bounds = array<i64: 1, 128>}, {transform_indices = @transform_3, window_bounds = array<i64: 8, 128>}]} {
    %c0 = arith.constant 0 : index
    %c0_0 = arith.constant 0 : index
    %0 = vector.load %arg1[%c0, %c0_0] : memref<8x9xf32, #tpu.memory_space<vmem>>, vector<8x9xf32>
    %c0_1 = arith.constant 0 : index
    %c0_2 = arith.constant 0 : index
    %1 = vector.load %arg2[%c0_1, %c0_2] : memref<9x128xf32, #tpu.memory_space<vmem>>, vector<9x128xf32>
    %cst = arith.constant dense<0.000000e+00> : vector<8x128xf32>
    %2 = tpu.matmul %0, %1, %cst {dimension_numbers = #tpu.dot_dimension_numbers<[1], [0], [0], [1], [0, 0, 1, 1], [], []>} : vector<8x9xf32>, vector<9x128xf32>, vector<8x128xf32> -> vector<8x128xf32>
    %c0_3 = arith.constant 0 : index
    %c0_4 = arith.constant 0 : index
    %3 = vector.load %arg3[%c0_3, %c0_4] : memref<1x128xf32, #tpu.memory_space<vmem>>, vector<1x128xf32>
    %4 = vector.broadcast %3 : vector<1x128xf32> to vector<8x128xf32>
    %5 = arith.addf %2, %4 : vector<8x128xf32>
    %cst_5 = arith.constant 0.000000e+00 : f32
    %6 = vector.broadcast %cst_5 : f32 to vector<8x128xf32>
    %7 = arith.maximumf %5, %6 : vector<8x128xf32>
    %c0_6 = arith.constant 0 : index
    %c0_7 = arith.constant 0 : index
    %8 = vector.load %arg4[%c0_6, %c0_7] : memref<8x128xf32, #tpu.memory_space<vmem>>, vector<8x128xf32>
    tpu.vector_store %arg4[%c0_6, %c0_7], %7 {strides = array<i32>} : memref<8x128xf32, #tpu.memory_space<vmem>>, vector<8x128xf32>,
    return
  }
  func.func @transform_0(%arg0: i32) -> (i32, i32) {
    %c0_i32 = arith.constant 0 : i32
    %c0_i32_0 = arith.constant 0 : i32
    return %arg0, %c0_i32 : i32, i32
  }
  func.func @transform_1(%arg0: i32) -> (i32, i32) {
    %c0_i32 = arith.constant 0 : i32
    %c0_i32_0 = arith.constant 0 : i32
    %c0_i32_1 = arith.constant 0 : i32
    return %c0_i32, %c0_i32_0 : i32, i32
  }
  func.func @transform_2(%arg0: i32) -> (i32, i32) {
    %c0_i32 = arith.constant 0 : i32
    %c0_i32_0 = arith.constant 0 : i32
    %c0_i32_1 = arith.constant 0 : i32
    return %c0_i32, %c0_i32_0 : i32, i32
  }
  func.func @transform_3(%arg0: i32) -> (i32, i32) {
    %c0_i32 = arith.constant 0 : i32
    %c0_i32_0 = arith.constant 0 : i32
    return %arg0, %c0_i32 : i32, i32
  }
}

module attributes {stable_mosaic.version = 11 : i64} {
  func.func @rgcn_layer_kernel(%arg0: i32, %arg1: i32, %arg2: memref<128x128xf32, #tpu.memory_space<vmem>>, %arg3: memref<128x128xf32, #tpu.memory_space<vmem>>, %arg4: memref<1x128x128xbf16, #tpu.memory_space<vmem>>, %arg5: memref<1x128x128xbf16, #tpu.memory_space<vmem>>, %arg6: memref<128x128xf32, #tpu.memory_space<vmem>>) attributes {dimension_semantics = [#tpu.dimension_semantics<parallel>, #tpu.dimension_semantics<arbitrary>], iteration_bounds = array<i64: 1, 3>, scalar_prefetch = 0 : i64, scratch_operands = 0 : i64, tpu.core_type = #tpu.core_type<tc>, window_params = [{transform_indices = @transform_0, window_bounds = array<i64: 128, 128>}, {pipeline_mode = #tpu.pipeline_mode<synchronous>, transform_indices = @transform_1, window_bounds = array<i64: 128, 128>}, {transform_indices = @transform_2, window_bounds = array<i64: 1, 128, 128>}, {transform_indices = @transform_3, window_bounds = array<i64: 1, 128, 128>}, {transform_indices = @transform_4, window_bounds = array<i64: 128, 128>}]} {
    %c0_i32 = arith.constant 0 : i32
    %0 = arith.cmpi eq, %arg1, %c0_i32 : i32
    %1 = arith.extui %0 : i1 to i32
    %c0_i32_0 = arith.constant 0 : i32
    %2 = arith.cmpi ne, %1, %c0_i32_0 : i32
    scf.if %2 {
      %c0_11 = arith.constant 0 : index
      %c0_12 = arith.constant 0 : index
      %14 = vector.load %arg2[%c0_11, %c0_12] : memref<128x128xf32, #tpu.memory_space<vmem>>, vector<128x128xf32>
      %c0_13 = arith.constant 0 : index
      %c0_14 = arith.constant 0 : index
      %15 = vector.load %arg3[%c0_13, %c0_14] : memref<128x128xf32, #tpu.memory_space<vmem>>, vector<128x128xf32>
      %cst_15 = arith.constant dense<0.000000e+00> : vector<128x128xf32>
      %16 = tpu.matmul %14, %15, %cst_15 {dimension_numbers = #tpu.dot_dimension_numbers<[1], [0], [0], [1], [0, 0, 1, 1], [], []>} : vector<128x128xf32>, vector<128x128xf32>, vector<128x128xf32> -> vector<128x128xf32>
      %c0_16 = arith.constant 0 : index
      %c0_17 = arith.constant 0 : index
      %17 = vector.load %arg6[%c0_16, %c0_17] : memref<128x128xf32, #tpu.memory_space<vmem>>, vector<128x128xf32>
      tpu.vector_store %arg6[%c0_16, %c0_17], %16 {strides = array<i32>} : memref<128x128xf32, #tpu.memory_space<vmem>>, vector<128x128xf32>,
    } else {
    }
    %c0 = arith.constant 0 : index
    %c0_1 = arith.constant 0 : index
    %3 = vector.load %arg6[%c0, %c0_1] : memref<128x128xf32, #tpu.memory_space<vmem>>, vector<128x128xf32>
    %c0_2 = arith.constant 0 : index
    %c0_3 = arith.constant 0 : index
    %c0_4 = arith.constant 0 : index
    %4 = vector.load %arg4[%c0_2, %c0_3, %c0_4] : memref<1x128x128xbf16, #tpu.memory_space<vmem>>, vector<1x128x128xbf16>
    %5 = vector.shape_cast %4 : vector<1x128x128xbf16> to vector<128x128xbf16>
    %c0_5 = arith.constant 0 : index
    %c0_6 = arith.constant 0 : index
    %c0_7 = arith.constant 0 : index
    %6 = vector.load %arg5[%c0_5, %c0_6, %c0_7] : memref<1x128x128xbf16, #tpu.memory_space<vmem>>, vector<1x128x128xbf16>
    %7 = vector.shape_cast %6 : vector<1x128x128xbf16> to vector<128x128xbf16>
    %cst = arith.constant dense<0.000000e+00> : vector<128x128xf32>
    %8 = tpu.matmul %5, %7, %cst {dimension_numbers = #tpu.dot_dimension_numbers<[1], [0], [0], [1], [0, 0, 1, 1], [], []>} : vector<128x128xbf16>, vector<128x128xbf16>, vector<128x128xf32> -> vector<128x128xf32>
    %9 = arith.addf %3, %8 : vector<128x128xf32>
    %c0_8 = arith.constant 0 : index
    %c0_9 = arith.constant 0 : index
    %10 = vector.load %arg6[%c0_8, %c0_9] : memref<128x128xf32, #tpu.memory_space<vmem>>, vector<128x128xf32>
    tpu.vector_store %arg6[%c0_8, %c0_9], %9 {strides = array<i32>} : memref<128x128xf32, #tpu.memory_space<vmem>>, vector<128x128xf32>,
    %c2_i32 = arith.constant 2 : i32
    %11 = arith.cmpi eq, %arg1, %c2_i32 : i32
    %12 = arith.extui %11 : i1 to i32
    %c0_i32_10 = arith.constant 0 : i32
    %13 = arith.cmpi ne, %12, %c0_i32_10 : i32
    scf.if %13 {
      %c0_11 = arith.constant 0 : index
      %c0_12 = arith.constant 0 : index
      %14 = vector.load %arg6[%c0_11, %c0_12] : memref<128x128xf32, #tpu.memory_space<vmem>>, vector<128x128xf32>
      %cst_13 = arith.constant 0.000000e+00 : f32
      %15 = vector.broadcast %cst_13 : f32 to vector<128x128xf32>
      %16 = arith.maximumf %14, %15 : vector<128x128xf32>
      %c0_14 = arith.constant 0 : index
      %c0_15 = arith.constant 0 : index
      %17 = vector.load %arg6[%c0_14, %c0_15] : memref<128x128xf32, #tpu.memory_space<vmem>>, vector<128x128xf32>
      tpu.vector_store %arg6[%c0_14, %c0_15], %16 {strides = array<i32>} : memref<128x128xf32, #tpu.memory_space<vmem>>, vector<128x128xf32>,
    } else {
    }
    return
  }
  func.func @transform_0(%arg0: i32, %arg1: i32) -> (i32, i32) {
    %c0_i32 = arith.constant 0 : i32
    %c0_i32_0 = arith.constant 0 : i32
    return %arg0, %c0_i32 : i32, i32
  }
  func.func @transform_1(%arg0: i32, %arg1: i32) -> (i32, i32) {
    %c0_i32 = arith.constant 0 : i32
    %c0_i32_0 = arith.constant 0 : i32
    %c0_i32_1 = arith.constant 0 : i32
    return %c0_i32, %c0_i32_0 : i32, i32
  }
  func.func @transform_2(%arg0: i32, %arg1: i32) -> (i32, i32, i32) {
    %c0_i32 = arith.constant 0 : i32
    %c0_i32_0 = arith.constant 0 : i32
    return %arg1, %arg0, %c0_i32 : i32, i32, i32
  }
  func.func @transform_3(%arg0: i32, %arg1: i32) -> (i32, i32, i32) {
    %c0_i32 = arith.constant 0 : i32
    %c0_i32_0 = arith.constant 0 : i32
    %c0_i32_1 = arith.constant 0 : i32
    return %arg1, %c0_i32, %c0_i32_0 : i32, i32, i32
  }
  func.func @transform_4(%arg0: i32, %arg1: i32) -> (i32, i32) {
    %c0_i32 = arith.constant 0 : i32
    %c0_i32_0 = arith.constant 0 : i32
    return %arg0, %c0_i32 : i32, i32
  }
}

module attributes {stable_mosaic.version = 11 : i64} {
  func.func @rgcn_layer_kernel(%arg0: i32, %arg1: i32, %arg2: memref<128x128xf32, #tpu.memory_space<vmem>>, %arg3: memref<128x128xf32, #tpu.memory_space<vmem>>, %arg4: memref<1x128x128xbf16, #tpu.memory_space<vmem>>, %arg5: memref<1x128x128xbf16, #tpu.memory_space<vmem>>, %arg6: memref<128x128xf32, #tpu.memory_space<vmem>>) attributes {dimension_semantics = [#tpu.dimension_semantics<parallel>, #tpu.dimension_semantics<arbitrary>], iteration_bounds = array<i64: 1, 3>, scalar_prefetch = 0 : i64, scratch_operands = 0 : i64, tpu.core_type = #tpu.core_type<tc>, window_params = [{transform_indices = @transform_0, window_bounds = array<i64: 128, 128>}, {pipeline_mode = #tpu.pipeline_mode<synchronous>, transform_indices = @transform_1, window_bounds = array<i64: 128, 128>}, {transform_indices = @transform_2, window_bounds = array<i64: 1, 128, 128>}, {transform_indices = @transform_3, window_bounds = array<i64: 1, 128, 128>}, {transform_indices = @transform_4, window_bounds = array<i64: 128, 128>}]} {
    %c0_i32 = arith.constant 0 : i32
    %0 = arith.cmpi eq, %arg1, %c0_i32 : i32
    %1 = arith.extui %0 : i1 to i32
    %c0_i32_0 = arith.constant 0 : i32
    %2 = arith.cmpi ne, %1, %c0_i32_0 : i32
    scf.if %2 {
      %c0_10 = arith.constant 0 : index
      %c0_11 = arith.constant 0 : index
      %11 = vector.load %arg2[%c0_10, %c0_11] : memref<128x128xf32, #tpu.memory_space<vmem>>, vector<128x128xf32>
      %c0_12 = arith.constant 0 : index
      %c0_13 = arith.constant 0 : index
      %12 = vector.load %arg3[%c0_12, %c0_13] : memref<128x128xf32, #tpu.memory_space<vmem>>, vector<128x128xf32>
      %cst_14 = arith.constant dense<0.000000e+00> : vector<128x128xf32>
      %13 = tpu.matmul %11, %12, %cst_14 {dimension_numbers = #tpu.dot_dimension_numbers<[1], [0], [0], [1], [0, 0, 1, 1], [], []>} : vector<128x128xf32>, vector<128x128xf32>, vector<128x128xf32> -> vector<128x128xf32>
      %c0_15 = arith.constant 0 : index
      %c0_16 = arith.constant 0 : index
      %14 = vector.load %arg6[%c0_15, %c0_16] : memref<128x128xf32, #tpu.memory_space<vmem>>, vector<128x128xf32>
      tpu.vector_store %arg6[%c0_15, %c0_16], %13 {strides = array<i32>} : memref<128x128xf32, #tpu.memory_space<vmem>>, vector<128x128xf32>,
    } else {
    }
    %c0 = arith.constant 0 : index
    %c0_1 = arith.constant 0 : index
    %3 = vector.load %arg6[%c0, %c0_1] : memref<128x128xf32, #tpu.memory_space<vmem>>, vector<128x128xf32>
    %c0_2 = arith.constant 0 : index
    %c0_3 = arith.constant 0 : index
    %c0_4 = arith.constant 0 : index
    %4 = vector.load %arg4[%c0_2, %c0_3, %c0_4] : memref<1x128x128xbf16, #tpu.memory_space<vmem>>, vector<1x128x128xbf16>
    %5 = vector.shape_cast %4 : vector<1x128x128xbf16> to vector<128x128xbf16>
    %c0_5 = arith.constant 0 : index
    %c0_6 = arith.constant 0 : index
    %c0_7 = arith.constant 0 : index
    %6 = vector.load %arg5[%c0_5, %c0_6, %c0_7] : memref<1x128x128xbf16, #tpu.memory_space<vmem>>, vector<1x128x128xbf16>
    %7 = vector.shape_cast %6 : vector<1x128x128xbf16> to vector<128x128xbf16>
    %cst = arith.constant dense<0.000000e+00> : vector<128x128xf32>
    %8 = tpu.matmul %5, %7, %cst {dimension_numbers = #tpu.dot_dimension_numbers<[1], [0], [0], [1], [0, 0, 1, 1], [], []>} : vector<128x128xbf16>, vector<128x128xbf16>, vector<128x128xf32> -> vector<128x128xf32>
    %9 = arith.addf %3, %8 : vector<128x128xf32>
    %c0_8 = arith.constant 0 : index
    %c0_9 = arith.constant 0 : index
    %10 = vector.load %arg6[%c0_8, %c0_9] : memref<128x128xf32, #tpu.memory_space<vmem>>, vector<128x128xf32>
    tpu.vector_store %arg6[%c0_8, %c0_9], %9 {strides = array<i32>} : memref<128x128xf32, #tpu.memory_space<vmem>>, vector<128x128xf32>,
    return
  }
  func.func @transform_0(%arg0: i32, %arg1: i32) -> (i32, i32) {
    %c0_i32 = arith.constant 0 : i32
    %c0_i32_0 = arith.constant 0 : i32
    return %arg0, %c0_i32 : i32, i32
  }
  func.func @transform_1(%arg0: i32, %arg1: i32) -> (i32, i32) {
    %c0_i32 = arith.constant 0 : i32
    %c0_i32_0 = arith.constant 0 : i32
    %c0_i32_1 = arith.constant 0 : i32
    return %c0_i32, %c0_i32_0 : i32, i32
  }
  func.func @transform_2(%arg0: i32, %arg1: i32) -> (i32, i32, i32) {
    %c0_i32 = arith.constant 0 : i32
    %c0_i32_0 = arith.constant 0 : i32
    return %arg1, %arg0, %c0_i32 : i32, i32, i32
  }
  func.func @transform_3(%arg0: i32, %arg1: i32) -> (i32, i32, i32) {
    %c0_i32 = arith.constant 0 : i32
    %c0_i32_0 = arith.constant 0 : i32
    %c0_i32_1 = arith.constant 0 : i32
    return %arg1, %c0_i32, %c0_i32_0 : i32, i32, i32
  }
  func.func @transform_4(%arg0: i32, %arg1: i32) -> (i32, i32) {
    %c0_i32 = arith.constant 0 : i32
    %c0_i32_0 = arith.constant 0 : i32
    return %arg0, %c0_i32 : i32, i32
  }
}

</mosaic_0001>

<bundles_post_ra>
// kernel: res_rgcn_forward.5
= control target key start
LH: loop header
LB: loop body
LE: loop exit
PB: predicated region body
PF: predicated region fallthrough
CT: control target
= control target key end

     0   :  { %vm32_vm0 = vcmask 1043456   ;;  %vm25_vm1 = vcmask 97280   ;;  %vm141_vm2 = vmmov 1   ;;  %s183_s1 = inlined_call_operand.vmem [shape: f32[12,128], index: 1, kind: input, shape index: {}]   ;;  %s184_s0 = inlined_call_operand.vmem [shape: f32[16,12], index: 0, kind: input, shape index: {}]   ;;  %s185_s2 = inlined_call_operand.vmem [shape: f32[1,128], index: 2, kind: input, shape index: {}]   ;;  %s186_s3 = inlined_call_operand.vmem [shape: f32[16,128], index: 3, kind: output, shape index: {}]  }
   0x1   :  { %v16_v0 = vld [vmem:[%s183_s1] sm:$0xff]  ;;  %v17_v1 = vld [vmem:[%s183_s1 + $0x8] sm:$0xf]  ;;  %vm135_vm3 = vmpackc.low %vm32_vm0, %vm141_vm2 }
   0x2   :  { %v134_v2 = vpack.c.bf16 %v17_v1, %v16_v0  ;;  %v14_v3 = vld [vmem:[%s184_s0] sm:$0xff]  ;;  %v15_v4 = vld [vmem:[%s184_s0 + $0x8] sm:$0xff] }
   0x3   :  { %131 = vmatprep.mubr.msk.f32.mxu0 %vm25_vm1, %v14_v3  ;;  %v119_v5 = vld [vmem:[%s185_s2] ss:$0 sm:$0xff] }
   0x4   :  { %136 = vmatprep.subr.msk.bf16.mxu0 %vm135_vm3, %v134_v2 }
   0x5   :  { %139 = vmatpush3.bf16.msk.msra.mxu0 %vm135_vm3, %v134_v2 }
   0x8   :  { %132 = vmatmul.mubr.msk.f32.vlgmr.msra.gmra.mrb[0].mxu0 %vm25_vm1, %v15_v4 }
  0xdb   :  { %v133_v6 = vpop.f32.mrb[0].mxu0 }
  0xdc   :  { %v108_v7 = vadd.f32 %v133_v6, %v119_v5  ;;  %v102_v8 = vpop.f32.mrb[1].mxu0 }
  0xdd   :  { %v103_v9 = vadd.f32 %v119_v5, %v102_v8 }
  0xde   :  { %v112_v10 = vmax.f32 %v108_v7, 0.0 }
  0xdf   :  { %v111_v11 = vmax.f32 %v103_v9, 0.0 }
  0xe0   :  { %114 = vst [vmem:[%s186_s3 + $0x8] sm:$0xff] %v112_v10 }
  0xe1   :  { %113 = vst [vmem:[%s186_s3] sm:$0xff] %v111_v11 }

// kernel: res_rgcn_forward.6
= control target key start
LH: loop header
LB: loop body
LE: loop exit
PB: predicated region body
PF: predicated region fallthrough
CT: control target
= control target key end

     0   :  { %vm28_vm0 = vcmask 1040384   ;;  %v129_v0 = vmov 0.0|0.0   ;;  %vm130_vm1 = vmmov 1   ;;  %vm131_vm3 = vmmov 0   ;;  %s168_s1 = inlined_call_operand.vmem [shape: f32[9,128], index: 1, kind: input, shape index: {}]   ;;  %s169_s0 = inlined_call_operand.vmem [shape: f32[8,9], index: 0, kind: input, shape index: {}]   ;;  %s170_s2 = inlined_call_operand.vmem [shape: f32[1,128], index: 2, kind: input, shape index: {}]   ;;  %s171_s3 = inlined_call_operand.vmem [shape: f32[8,128], index: 3, kind: output, shape index: {}]  }
   0x1   :  { %121 = vmatprep.subr.bf16.mxu0 %v129_v0  ;;  %v15_v1 = vld [vmem:[%s168_s1] sm:$0xff]  ;;  %v16_v2 = vld [vmem:[%s168_s1 + $0x8] sm:$0x1]  ;;  %vm123_vm2 = vmpackc.low %vm28_vm0, %vm130_vm1  ;;  %v132_v4 = vmov 0.0   ;;  %vm24_vm4 = vcmask 72704  }
   0x2   :  { %v122_v3 = vpack.c.bf16 %v16_v2, %v15_v1  ;;  %118 = vmatprep.mubr.msk.f32.mxu0 %vm131_vm3, %v132_v4  ;;  %v14_v5 = vld [vmem:[%s169_s0] sm:$0xff] }
   0x3   :  { %v108_v6 = vld [vmem:[%s170_s2] ss:$0 sm:$0xff] }
   0x4   :  { %124 = vmatpush3.bf16.msk.msra.mxu0 %vm123_vm2, %v122_v3 }
   0x7   :  { %119 = vmatmul.mubr.msk.f32.vlgmr.msra.gmra.mrb[0].mxu0 %vm24_vm4, %v14_v5 }
  0xda   :  { %v98_v7 = vpop.f32.mrb[0].mxu0 }
  0xdb   :  { %v99_v8 = vadd.f32 %v108_v6, %v98_v7  ;;  %v120_v9 = vpop.f32.mrb[1].mxu0 }
  0xdd   :  { %v102_v10 = vmax.f32 %v99_v8, 0.0 }
  0xdf   :  { %103 = vst [vmem:[%s171_s3] sm:$0xff] %v102_v10 }

// kernel: res_rgcn_forward.7
= control target key start
LH: loop header
LB: loop body
LE: loop exit
PB: predicated region body
PF: predicated region fallthrough
CT: control target
= control target key end

     0   :  { %s1209_s15 = smov 0   ;;  %s1211_s16 = smov 0   ;;  %s1604_s0 = inlined_call_operand.vmem [shape: f32[128,128], index: 0, kind: input, shape index: {}]   ;;  %s1605_s1 = inlined_call_operand.vmem [shape: f32[128,128], index: 1, kind: input, shape index: {}]   ;;  %s1606_s2 = inlined_call_operand.vmem [shape: bf16[3,128,128], index: 2, kind: input, shape index: {}]   ;;  %s1607_s3 = inlined_call_operand.vmem [shape: bf16[3,128,128], index: 3, kind: input, shape index: {}]   ;;  %s1608_s4 = inlined_call_operand.vmem [shape: f32[128,128], index: 4, kind: output, shape index: {}]  }
   0x1   :  { %s1213_s17 = smov 0  }
   0x2 LB: > { %s23_s18 = sadd.s32 1, %s1178_s16  ;;  %p891_p0 = scmp.ge.s32.totalorder %s1182_s17, 1  ;;  %s1182_s17 = sphi %s1213_s17, %s14_s17   ;;  %s1178_s16 = sphi %s1211_s16, %s1610_s16   ;;  %s1174_s15 = sphi %s1209_s15, %s1609_s15  }
   0x3   : > { %p24_p1 = scmp.ge.s32.totalorder %s23_s18, 3  ;;  %p202_p2 = scmp.lt.s32.totalorder %s1182_s17, 4 }
   0x5   : > { %s1612_s18 = smov (%p24_p1, %s23_s18), 0  ;;  %p203_p3 = pnand %p891_p0, %p202_p2 }
   0x6   : > { %p249_p4 = scmp.lt.s32.totalorder (!%p203_p3), %s1174_s15, 2  ;;  %p896_p5 = scmp.ne.s32.totalorder (!%p203_p3), %s1174_s15, 0 }
   0x7   : > { %206 = sbr.rel (%p203_p3) target bundleno = 546 (0x222), region = 36 }
   0xe   : > { %s250_s19 = scalar_select %p249_p4, %s1174_s15, 2 }
   0xf   : > { %273 = sbr.rel (%p896_p5) target bundleno = 276 (0x114), region = 40  ;;  %v290_v0 = vld [vmem:[%s1605_s1] sm:$0xff] (!%p896_p5)  ;;  %v291_v1 = vld [vmem:[%s1605_s1 + $0x8] sm:$0xff] (!%p896_p5)  ;;  %v292_v2 = vld [vmem:[%s1605_s1 + $0x10] sm:$0xff] (!%p896_p5) }
  0x10   : > { %s918_s20 = sshll.u32 %s250_s19, 6  ;;  %v1056_v3 = vpack.c.bf16 (!%p896_p5), %v291_v1, %v290_v0  ;;  %v293_v4 = vld [vmem:[%s1605_s1 + $0x18] sm:$0xff] (!%p896_p5)  ;;  %v294_v6 = vld [vmem:[%s1605_s1 + $0x20] sm:$0xff] (!%p896_p5)  ;;  %v295_v7 = vld [vmem:[%s1605_s1 + $0x28] sm:$0xff] (!%p896_p5) }
  0x11   : > { %s1234_s23 = scalar_lea.vmem %s1606_s2, %s918_s20  ;;  %s1239_s26 = scalar_lea.vmem %s1607_s3, %s918_s20  ;;  %v1060_v5 = vpack.c.bf16 (!%p896_p5), %v293_v4, %v292_v2  ;;  %v1064_v8 = vpack.c.bf16 (!%p896_p5), %v295_v7, %v294_v6  ;;  %v274_v9 = vld [vmem:[%s1604_s0] sm:$0xff] (!%p896_p5)  ;;  %v296_v11 = vld [vmem:[%s1605_s1 + $0x30] sm:$0xff] (!%p896_p5)  ;;  %v297_v12 = vld [vmem:[%s1605_s1 + $0x38] sm:$0xff] (!%p896_p5) }
  0x12   : > { %1057 = vmatprep.subr.bf16.mxu0 (!%p896_p5), %v1056_v3  ;;  %1088 = vmatprep.subr.bf16.mxu1 (!%p896_p5), %v1056_v3  ;;  %v282_v10 = vld [vmem:[%s1604_s0 + $0x40] sm:$0xff] (!%p896_p5)  ;;  %v1068_v13 = vpack.c.bf16 (!%p896_p5), %v297_v12, %v296_v11  ;;  %v299_v15 = vld [vmem:[%s1605_s1 + $0x48] sm:$0xff] (!%p896_p5)  ;;  %v300_v17 = vld [vmem:[%s1605_s1 + $0x50] sm:$0xff] (!%p896_p5) }
  0x13   : > { %1059 = vmatpush3.bf16.msra.mxu0 (!%p896_p5), %v1056_v3  ;;  %1096 = vmatpush3.bf16.msra.mxu1 (!%p896_p5), %v1056_v3  ;;  %v298_v14 = vld [vmem:[%s1605_s1 + $0x40] sm:$0xff] (!%p896_p5)  ;;  %v301_v18 = vld [vmem:[%s1605_s1 + $0x58] sm:$0xff] (!%p896_p5)  ;;  %v303_v21 = vld [vmem:[%s1605_s1 + $0x68] sm:$0xff] (!%p896_p5) }
  0x14   : > { %1061 = vmatprep.subr.bf16.mxu0 (!%p896_p5), %v1060_v5  ;;  %1089 = vmatprep.subr.bf16.mxu1 (!%p896_p5), %v1060_v5  ;;  %v1072_v16 = vpack.c.bf16 (!%p896_p5), %v299_v15, %v298_v14  ;;  %v1076_v19 = vpack.c.bf16 (!%p896_p5), %v301_v18, %v300_v17  ;;  %v302_v20 = vld [vmem:[%s1605_s1 + $0x60] sm:$0xff] (!%p896_p5)  ;;  %v304_v23 = vld [vmem:[%s1605_s1 + $0x70] sm:$0xff] (!%p896_p5)  ;;  %v305_v24 = vld [vmem:[%s1605_s1 + $0x78] sm:$0xff] (!%p896_p5) }
  0x15   : > { %1000 = vmatprep.mubr.f32.mxu0 (!%p896_p5), %v274_v9  ;;  %1012 = vmatprep.mubr.f32.mxu1 (!%p896_p5), %v282_v10  ;;  %v1080_v22 = vpack.c.bf16 (!%p896_p5), %v303_v21, %v302_v20  ;;  %v1084_v25 = vpack.c.bf16 (!%p896_p5), %v305_v24, %v304_v23  ;;  %v275_v26 = vld [vmem:[%s1604_s0 + $0x8] sm:$0xff] (!%p896_p5)  ;;  %v276_v28 = vld [vmem:[%s1604_s0 + $0x10] sm:$0xff] (!%p896_p5)  ;;  %v277_v30 = vld [vmem:[%s1604_s0 + $0x18] sm:$0xff] (!%p896_p5) }
  0x16   : > { %v283_v27 = vld [vmem:[%s1604_s0 + $0x48] sm:$0xff]  ;;  %v284_v29 = vld [vmem:[%s1604_s0 + $0x50] sm:$0xff]  ;;  %v285_v31 = vld [vmem:[%s1604_s0 + $0x58] sm:$0xff] }
  0x17   : > { %1063 = vmatpush3.bf16.msra.mxu0 %v1060_v5  ;;  %1097 = vmatpush3.bf16.msra.mxu1 %v1060_v5  ;;  %v278_v32 = vld [vmem:[%s1604_s0 + $0x20] sm:$0xff]  ;;  %v279_v34 = vld [vmem:[%s1604_s0 + $0x28] sm:$0xff]  ;;  %v280_v36 = vld [vmem:[%s1604_s0 + $0x30] sm:$0xff] }
  0x18   : > { %1065 = vmatprep.subr.bf16.mxu0 %v1064_v8  ;;  %1090 = vmatprep.subr.bf16.mxu1 %v1064_v8  ;;  %v286_v33 = vld [vmem:[%s1604_s0 + $0x60] sm:$0xff]  ;;  %v287_v35 = vld [vmem:[%s1604_s0 + $0x68] sm:$0xff]  ;;  %v288_v37 = vld [vmem:[%s1604_s0 + $0x70] sm:$0xff] }
  0x19   : > { %v281_v38 = vld [vmem:[%s1604_s0 + $0x38] sm:$0xff] }
  0x1a   : > { %v289_v39 = vld [vmem:[%s1604_s0 + $0x78] sm:$0xff] }
  0x1b   : > { %1067 = vmatpush3.bf16.msra.mxu0 %v1064_v8  ;;  %1098 = vmatpush3.bf16.msra.mxu1 %v1064_v8 }
  0x1c   : > { %1069 = vmatprep.subr.bf16.mxu0 %v1068_v13  ;;  %1091 = vmatprep.subr.bf16.mxu1 %v1068_v13 }
  0x1f   : > { %1071 = vmatpush3.bf16.msra.mxu0 %v1068_v13  ;;  %1099 = vmatpush3.bf16.msra.mxu1 %v1068_v13 }
  0x20   : > { %1073 = vmatprep.subr.bf16.mxu0 %v1072_v16  ;;  %1092 = vmatprep.subr.bf16.mxu1 %v1072_v16 }
  0x23   : > { %1075 = vmatpush3.bf16.msra.mxu0 %v1072_v16  ;;  %1100 = vmatpush3.bf16.msra.mxu1 %v1072_v16 }
  0x24   : > { %1077 = vmatprep.subr.bf16.mxu0 %v1076_v19  ;;  %1093 = vmatprep.subr.bf16.mxu1 %v1076_v19 }
  0x27   : > { %1079 = vmatpush3.bf16.msra.mxu0 %v1076_v19  ;;  %1101 = vmatpush3.bf16.msra.mxu1 %v1076_v19 }
  0x28   : > { %1081 = vmatprep.subr.bf16.mxu0 %v1080_v22  ;;  %1094 = vmatprep.subr.bf16.mxu1 %v1080_v22 }
  0x2b   : > { %1083 = vmatpush3.bf16.msra.mxu0 %v1080_v22  ;;  %1102 = vmatpush3.bf16.msra.mxu1 %v1080_v22 }
  0x2c   : > { %1085 = vmatprep.subr.bf16.mxu0 %v1084_v25  ;;  %1095 = vmatprep.subr.bf16.mxu1 %v1084_v25 }
  0x2f   : > { %1087 = vmatpush3.bf16.msra.mxu0 %v1084_v25  ;;  %1103 = vmatpush3.bf16.msra.mxu1 %v1084_v25 }
  0x32   : > { %1001 = vmatmul.mubr.f32.vlgmr.msra.gmra.mrb[0].mxu0 %v275_v26  ;;  %1013 = vmatmul.mubr.f32.vlgmr.msra.gmra.mrb[0].mxu1 %v283_v27 }
  0x33   : > { %1003 = vmatprep.mubr.f32.mxu0 %v276_v28  ;;  %1015 = vmatprep.mubr.f32.mxu1 %v284_v29 }
  0x36   : > { %1004 = vmatmul.mubr.f32.gmra.mrb[2].mxu0 %v277_v30  ;;  %1016 = vmatmul.mubr.f32.gmra.mrb[2].mxu1 %v285_v31 }
  0x37   : > { %1006 = vmatprep.mubr.f32.mxu0 %v278_v32  ;;  %1018 = vmatprep.mubr.f32.mxu1 %v286_v33 }
  0x3a   : > { %1007 = vmatmul.mubr.f32.gmra.mrb[4].mxu0 %v279_v34  ;;  %1019 = vmatmul.mubr.f32.gmra.mrb[4].mxu1 %v287_v35 }
  0x3b   : > { %1009 = vmatprep.mubr.f32.mxu0 %v280_v36  ;;  %1021 = vmatprep.mubr.f32.mxu1 %v288_v37 }
  0x3e   : > { %1010 = vmatmul.mubr.f32.gmra.mrb[6].mxu0 %v281_v38  ;;  %1022 = vmatmul.mubr.f32.gmra.mrb[6].mxu1 %v289_v39 }
 0x105   : > { %v1002_v40 = vpop.f32.mrb[0].mxu0  ;;  %v1014_v41 = vpop.f32.mrb[0].mxu1 }
 0x106   : > { %452 = vst [vmem:[%s1608_s4 + $0x8] sm:$0xff] %v1002_v40  ;;  %460 = vst [vmem:[%s1608_s4 + $0x48] sm:$0xff] %v1014_v41  ;;  %v372_v42 = vpop.f32.mrb[1].mxu0  ;;  %v412_v43 = vpop.f32.mrb[1].mxu1 }
 0x107   : > { %451 = vst [vmem:[%s1608_s4] sm:$0xff] %v372_v42  ;;  %459 = vst [vmem:[%s1608_s4 + $0x40] sm:$0xff] %v412_v43 }
 0x109   : > { %v1005_v44 = vpop.f32.mrb[2].mxu0  ;;  %v1017_v45 = vpop.f32.mrb[2].mxu1 }
 0x10a   : > { %454 = vst [vmem:[%s1608_s4 + $0x18] sm:$0xff] %v1005_v44  ;;  %462 = vst [vmem:[%s1608_s4 + $0x58] sm:$0xff] %v1017_v45  ;;  %v382_v46 = vpop.f32.mrb[3].mxu0  ;;  %v422_v47 = vpop.f32.mrb[3].mxu1 }
 0x10b   : > { %453 = vst [vmem:[%s1608_s4 + $0x10] sm:$0xff] %v382_v46  ;;  %461 = vst [vmem:[%s1608_s4 + $0x50] sm:$0xff] %v422_v47 }
 0x10d   : > { %v1008_v48 = vpop.f32.mrb[4].mxu0  ;;  %v1020_v49 = vpop.f32.mrb[4].mxu1 }
 0x10e   : > { %456 = vst [vmem:[%s1608_s4 + $0x28] sm:$0xff] %v1008_v48  ;;  %464 = vst [vmem:[%s1608_s4 + $0x68] sm:$0xff] %v1020_v49  ;;  %v392_v50 = vpop.f32.mrb[5].mxu0  ;;  %v432_v51 = vpop.f32.mrb[5].mxu1 }
 0x10f   : > { %455 = vst [vmem:[%s1608_s4 + $0x20] sm:$0xff] %v392_v50  ;;  %463 = vst [vmem:[%s1608_s4 + $0x60] sm:$0xff] %v432_v51 }
 0x111   : > { %v1011_v52 = vpop.f32.mrb[6].mxu0  ;;  %v1023_v53 = vpop.f32.mrb[6].mxu1 }
 0x112   : > { %458 = vst [vmem:[%s1608_s4 + $0x38] sm:$0xff] %v1011_v52  ;;  %466 = vst [vmem:[%s1608_s4 + $0x78] sm:$0xff] %v1023_v53  ;;  %v402_v54 = vpop.f32.mrb[7].mxu0  ;;  %v442_v55 = vpop.f32.mrb[7].mxu1 }
 0x113   : > { %457 = vst [vmem:[%s1608_s4 + $0x30] sm:$0xff] %v402_v54  ;;  %465 = vst [vmem:[%s1608_s4 + $0x70] sm:$0xff] %v442_v55 }
 0x114 PF: > { %v1144_v56 = vld [vmem:[%s1239_s26] sm:$0xff]   ;;  %v1145_v57 = vld [vmem:[%s1239_s26 + $0x8] sm:$0xff]   ;;  %v1146_v58 = vld [vmem:[%s1239_s26 + $0x10] sm:$0xff]   ;;  %p913_p6 = scmp.ne.s32.totalorder %s1174_s15, 2 }
 0x115   : > { %1024 = vmatprep.subr.bf16.mxu0 %v1144_v56  ;;  %1104 = vmatprep.subr.bf16.mxu1 %v1144_v56  ;;  %v1147_v59 = vld [vmem:[%s1239_s26 + $0x18] sm:$0xff]   ;;  %v1152_v60 = vld [vmem:[%s1234_s23] sm:$0xff]   ;;  %v1149_v63 = vld [vmem:[%s1239_s26 + $0x28] sm:$0xff]  }
 0x116   : > { %1025 = vmatpush3.bf16.msra.mxu0 %v1144_v56  ;;  %1112 = vmatpush3.bf16.msra.mxu1 %v1144_v56  ;;  %v1153_v61 = vld [vmem:[%s1234_s23 + $0x20] sm:$0xff]   ;;  %v1150_v0 = vld [vmem:[%s1239_s26 + $0x30] sm:$0xff]   ;;  %v1151_v1 = vld [vmem:[%s1239_s26 + $0x38] sm:$0xff]  }
 0x117   : > { %1026 = vmatprep.subr.bf16.mxu0 %v1145_v57  ;;  %1105 = vmatprep.subr.bf16.mxu1 %v1145_v57  ;;  %v1148_v62 = vld [vmem:[%s1239_s26 + $0x20] sm:$0xff]   ;;  %v1154_v2 = vld [vmem:[%s1234_s23 + $0x8] sm:$0xff]   ;;  %v1156_v4 = vld [vmem:[%s1234_s23 + $0x10] sm:$0xff]  }
 0x118   : > { %1040 = vmatprep.mubr.bf16.mxu0 %v1152_v60  ;;  %1048 = vmatprep.mubr.bf16.mxu1 %v1153_v61  ;;  %v1155_v3 = vld [vmem:[%s1234_s23 + $0x28] sm:$0xff]   ;;  %v1157_v5 = vld [vmem:[%s1234_s23 + $0x30] sm:$0xff]   ;;  %v1158_v6 = vld [vmem:[%s1234_s23 + $0x18] sm:$0xff]  }
 0x119   : > { %v1159_v7 = vld [vmem:[%s1234_s23 + $0x38] sm:$0xff]   ;;  %v469_v8 = vld [vmem:[%s1608_s4 + $0x10] sm:$0xff]  ;;  %v467_v10 = vld [vmem:[%s1608_s4] sm:$0xff] }
 0x11a   : > { %1027 = vmatpush3.bf16.msra.mxu0 %v1145_v57  ;;  %1113 = vmatpush3.bf16.msra.mxu1 %v1145_v57  ;;  %v477_v9 = vld [vmem:[%s1608_s4 + $0x50] sm:$0xff]  ;;  %v475_v11 = vld [vmem:[%s1608_s4 + $0x40] sm:$0xff]  ;;  %v470_v14 = vld [vmem:[%s1608_s4 + $0x18] sm:$0xff] }
 0x11b   : > { %1028 = vmatprep.subr.bf16.mxu0 %v1146_v58  ;;  %1106 = vmatprep.subr.bf16.mxu1 %v1146_v58  ;;  %v478_v15 = vld [vmem:[%s1608_s4 + $0x58] sm:$0xff]  ;;  %v468_v20 = vld [vmem:[%s1608_s4 + $0x8] sm:$0xff]  ;;  %v473_v32 = vld [vmem:[%s1608_s4 + $0x30] sm:$0xff] }
 0x11c   : > { %v476_v21 = vld [vmem:[%s1608_s4 + $0x48] sm:$0xff]  ;;  %v481_v33 = vld [vmem:[%s1608_s4 + $0x70] sm:$0xff]  ;;  %v471_v34 = vld [vmem:[%s1608_s4 + $0x20] sm:$0xff] }
 0x11d   : > { %v479_v35 = vld [vmem:[%s1608_s4 + $0x60] sm:$0xff]  ;;  %v474_v38 = vld [vmem:[%s1608_s4 + $0x38] sm:$0xff]  ;;  %v472_v44 = vld [vmem:[%s1608_s4 + $0x28] sm:$0xff] }
 0x11e   : > { %1029 = vmatpush3.bf16.msra.mxu0 %v1146_v58  ;;  %1114 = vmatpush3.bf16.msra.mxu1 %v1146_v58  ;;  %v482_v39 = vld [vmem:[%s1608_s4 + $0x78] sm:$0xff]  ;;  %v480_v45 = vld [vmem:[%s1608_s4 + $0x68] sm:$0xff] }
 0x11f   : > { %1030 = vmatprep.subr.bf16.mxu0 %v1147_v59  ;;  %1107 = vmatprep.subr.bf16.mxu1 %v1147_v59 }
 0x122   : > { %1031 = vmatpush3.bf16.msra.mxu0 %v1147_v59  ;;  %1115 = vmatpush3.bf16.msra.mxu1 %v1147_v59 }
 0x123   : > { %1032 = vmatprep.subr.bf16.mxu0 %v1148_v62  ;;  %1108 = vmatprep.subr.bf16.mxu1 %v1148_v62 }
 0x126   : > { %1033 = vmatpush3.bf16.msra.mxu0 %v1148_v62  ;;  %1116 = vmatpush3.bf16.msra.mxu1 %v1148_v62 }
 0x127   : > { %1034 = vmatprep.subr.bf16.mxu0 %v1149_v63  ;;  %1109 = vmatprep.subr.bf16.mxu1 %v1149_v63 }
 0x12a   : > { %1035 = vmatpush3.bf16.msra.mxu0 %v1149_v63  ;;  %1117 = vmatpush3.bf16.msra.mxu1 %v1149_v63 }
 0x12b   : > { %1036 = vmatprep.subr.bf16.mxu0 %v1150_v0  ;;  %1110 = vmatprep.subr.bf16.mxu1 %v1150_v0 }
 0x12e   : > { %1037 = vmatpush3.bf16.msra.mxu0 %v1150_v0  ;;  %1118 = vmatpush3.bf16.msra.mxu1 %v1150_v0 }
 0x12f   : > { %1038 = vmatprep.subr.bf16.mxu0 %v1151_v1  ;;  %1111 = vmatprep.subr.bf16.mxu1 %v1151_v1 }
 0x132   : > { %1039 = vmatpush3.bf16.msra.mxu0 %v1151_v1  ;;  %1119 = vmatpush3.bf16.msra.mxu1 %v1151_v1 }
 0x135   : > { %1041 = vmatmul.mubr.bf16.vlgmr.msra.gmra.mrb[0].mxu0 %v1154_v2  ;;  %1049 = vmatmul.mubr.bf16.vlgmr.msra.gmra.mrb[0].mxu1 %v1155_v3 }
 0x136   : > { %1044 = vmatprep.mubr.bf16.mxu0 %v1156_v4  ;;  %1052 = vmatprep.mubr.bf16.mxu1 %v1157_v5 }
 0x13d   : > { %1045 = vmatmul.mubr.bf16.gmra.mrb[4].mxu0 %v1158_v6  ;;  %1053 = vmatmul.mubr.bf16.gmra.mrb[4].mxu1 %v1159_v7 }
 0x208   : > { %v1042_v12 = vpop.f32.mrb[0].mxu0  ;;  %v1050_v13 = vpop.f32.mrb[0].mxu1 }
 0x209   : > { %v710_v16 = vadd.f32 %v1042_v12, %v469_v8  ;;  %v718_v17 = vadd.f32 %v1050_v13, %v477_v9  ;;  %v645_v18 = vpop.f32.mrb[1].mxu0  ;;  %v677_v19 = vpop.f32.mrb[1].mxu1 }
 0x20a   : > { %v708_v22 = vadd.f32 %v645_v18, %v467_v10  ;;  %v716_v23 = vadd.f32 %v677_v19, %v475_v11  ;;  %v1043_v24 = vpop.f32.mrb[2].mxu0  ;;  %v1051_v25 = vpop.f32.mrb[2].mxu1 }
 0x20b   : > { %726 = vst [vmem:[%s1608_s4 + $0x10] sm:$0xff] %v710_v16  ;;  %734 = vst [vmem:[%s1608_s4 + $0x50] sm:$0xff] %v718_v17  ;;  %v711_v26 = vadd.f32 %v1043_v24, %v470_v14  ;;  %v719_v27 = vadd.f32 %v1051_v25, %v478_v15  ;;  %v648_v28 = vpop.f32.mrb[3].mxu0  ;;  %v680_v29 = vpop.f32.mrb[3].mxu1 }
 0x20c   : > { %724 = vst [vmem:[%s1608_s4] sm:$0xff] %v708_v22  ;;  %732 = vst [vmem:[%s1608_s4 + $0x40] sm:$0xff] %v716_v23  ;;  %v709_v30 = vadd.f32 %v648_v28, %v468_v20  ;;  %v717_v31 = vadd.f32 %v680_v29, %v476_v21 }
 0x20d   : > { %727 = vst [vmem:[%s1608_s4 + $0x18] sm:$0xff] %v711_v26  ;;  %735 = vst [vmem:[%s1608_s4 + $0x58] sm:$0xff] %v719_v27 }
 0x20e   : > { %725 = vst [vmem:[%s1608_s4 + $0x8] sm:$0xff] %v709_v30  ;;  %733 = vst [vmem:[%s1608_s4 + $0x48] sm:$0xff] %v717_v31 }
 0x210   : > { %v1046_v36 = vpop.f32.mrb[4].mxu0  ;;  %v1054_v37 = vpop.f32.mrb[4].mxu1  ;;  %743 = sbr.rel (%p913_p6) target bundleno = 546 (0x222), region = 44 }
 0x211   : > { %v714_v40 = vadd.f32 %v1046_v36, %v473_v32  ;;  %v722_v41 = vadd.f32 %v1054_v37, %v481_v33  ;;  %v661_v42 = vpop.f32.mrb[5].mxu0  ;;  %v693_v43 = vpop.f32.mrb[5].mxu1 }
 0x212   : > { %v712_v46 = vadd.f32 %v661_v42, %v471_v34  ;;  %v720_v47 = vadd.f32 %v693_v43, %v479_v35  ;;  %v1047_v48 = vpop.f32.mrb[6].mxu0  ;;  %v1055_v49 = vpop.f32.mrb[6].mxu1  ;;  %v746_v58 = vld [vmem:[%s1608_s4 + $0x10] sm:$0xff] (!%p913_p6) }
 0x213   : > { %730 = vst [vmem:[%s1608_s4 + $0x30] sm:$0xff] %v714_v40  ;;  %738 = vst [vmem:[%s1608_s4 + $0x70] sm:$0xff] %v722_v41  ;;  %v715_v50 = vadd.f32 %v1047_v48, %v474_v38  ;;  %v723_v51 = vadd.f32 %v1055_v49, %v482_v39  ;;  %v664_v52 = vpop.f32.mrb[7].mxu0  ;;  %v696_v53 = vpop.f32.mrb[7].mxu1  ;;  %v744_v56 = vld [vmem:[%s1608_s4] sm:$0xff] (!%p913_p6)  ;;  %v762_v61 = vmax.f32 (!%p913_p6), %v746_v58, 0.0 }
 0x214   : > { %728 = vst [vmem:[%s1608_s4 + $0x20] sm:$0xff] %v712_v46  ;;  %736 = vst [vmem:[%s1608_s4 + $0x60] sm:$0xff] %v720_v47  ;;  %v713_v54 = vadd.f32 %v664_v52, %v472_v44  ;;  %v721_v55 = vadd.f32 %v696_v53, %v480_v45  ;;  %v760_v59 = vmax.f32 (!%p913_p6), %v744_v56, 0.0  ;;  %v747_v62 = vld [vmem:[%s1608_s4 + $0x18] sm:$0xff] (!%p913_p6)  ;;  %v752_v6 = vld [vmem:[%s1608_s4 + $0x40] sm:$0xff] (!%p913_p6) }
 0x215   : > { %731 = vst [vmem:[%s1608_s4 + $0x38] sm:$0xff] %v715_v50  ;;  %739 = vst [vmem:[%s1608_s4 + $0x78] sm:$0xff] %v723_v51  ;;  %v745_v57 = vld [vmem:[%s1608_s4 + $0x8] sm:$0xff] (!%p913_p6)  ;;  %v763_v1 = vmax.f32 (!%p913_p6), %v747_v62, 0.0  ;;  %v768_v9 = vmax.f32 (!%p913_p6), %v752_v6, 0.0  ;;  %v754_v11 = vld [vmem:[%s1608_s4 + $0x50] sm:$0xff] (!%p913_p6) }
 0x216   : > { %729 = vst [vmem:[%s1608_s4 + $0x28] sm:$0xff] %v713_v54  ;;  %737 = vst [vmem:[%s1608_s4 + $0x68] sm:$0xff] %v721_v55  ;;  %v761_v60 = vmax.f32 (!%p913_p6), %v745_v57, 0.0  ;;  %v753_v10 = vld [vmem:[%s1608_s4 + $0x48] sm:$0xff] (!%p913_p6)  ;;  %v755_v12 = vld [vmem:[%s1608_s4 + $0x58] sm:$0xff] (!%p913_p6)  ;;  %v770_v14 = vmax.f32 (!%p913_p6), %v754_v11, 0.0 }
 0x217   : > { %776 = vst [vmem:[%s1608_s4] sm:$0xff] %v760_v59  ;;  %778 = vst [vmem:[%s1608_s4 + $0x10] sm:$0xff] %v762_v61  ;;  %v769_v13 = vmax.f32 %v753_v10, 0.0  ;;  %v771_v15 = vmax.f32 %v755_v12, 0.0 }
 0x218   : > { %777 = vst [vmem:[%s1608_s4 + $0x8] sm:$0xff] %v761_v60  ;;  %779 = vst [vmem:[%s1608_s4 + $0x18] sm:$0xff] %v763_v1 }
 0x219   : > { %784 = vst [vmem:[%s1608_s4 + $0x40] sm:$0xff] %v768_v9  ;;  %785 = vst [vmem:[%s1608_s4 + $0x48] sm:$0xff] %v769_v13 }
 0x21a   : > { %v750_v4 = vld [vmem:[%s1608_s4 + $0x30] sm:$0xff]  ;;  %786 = vst [vmem:[%s1608_s4 + $0x50] sm:$0xff] %v770_v14  ;;  %787 = vst [vmem:[%s1608_s4 + $0x58] sm:$0xff] %v771_v15 }
 0x21b   : > { %v748_v63 = vld [vmem:[%s1608_s4 + $0x20] sm:$0xff]  ;;  %v766_v7 = vmax.f32 %v750_v4, 0.0  ;;  %v758_v18 = vld [vmem:[%s1608_s4 + $0x70] sm:$0xff] }
 0x21c   : > { %v764_v2 = vmax.f32 %v748_v63, 0.0  ;;  %v751_v5 = vld [vmem:[%s1608_s4 + $0x38] sm:$0xff]  ;;  %v756_v16 = vld [vmem:[%s1608_s4 + $0x60] sm:$0xff]  ;;  %v774_v21 = vmax.f32 %v758_v18, 0.0 }
 0x21d   : > { %v749_v0 = vld [vmem:[%s1608_s4 + $0x28] sm:$0xff]  ;;  %v767_v8 = vmax.f32 %v751_v5, 0.0  ;;  %782 = vst [vmem:[%s1608_s4 + $0x30] sm:$0xff] %v766_v7  ;;  %v772_v19 = vmax.f32 %v756_v16, 0.0  ;;  %v759_v22 = vld [vmem:[%s1608_s4 + $0x78] sm:$0xff] }
 0x21e   : > { %v765_v3 = vmax.f32 %v749_v0, 0.0  ;;  %780 = vst [vmem:[%s1608_s4 + $0x20] sm:$0xff] %v764_v2  ;;  %v757_v17 = vld [vmem:[%s1608_s4 + $0x68] sm:$0xff]  ;;  %v775_v23 = vmax.f32 %v759_v22, 0.0  ;;  %790 = vst [vmem:[%s1608_s4 + $0x70] sm:$0xff] %v774_v21 }
 0x21f   : > { %783 = vst [vmem:[%s1608_s4 + $0x38] sm:$0xff] %v767_v8  ;;  %v773_v20 = vmax.f32 %v757_v17, 0.0  ;;  %788 = vst [vmem:[%s1608_s4 + $0x60] sm:$0xff] %v772_v19 }
 0x220   : > { %781 = vst [vmem:[%s1608_s4 + $0x28] sm:$0xff] %v765_v3  ;;  %791 = vst [vmem:[%s1608_s4 + $0x78] sm:$0xff] %v775_v23 }
 0x221   : > { %789 = vst [vmem:[%s1608_s4 + $0x68] sm:$0xff] %v773_v20 }
 0x222 PF: > { %s14_s17 = sadd.s32 1, %s1182_s17   ;;  %s1609_s15 = smov %s1178_s16 }
 0x223   : > { %p11_p7 = scmp.ge.s32.totalorder %s14_s17, 5   ;;  %s1610_s16 = smov %s1612_s18 }
 0x225   :  { %13 = sbr.rel (!%p11_p7) target bundleno = 2 (0x2), region = 80 }

// kernel: res_rgcn_forward.9
= control target key start
LH: loop header
LB: loop body
LE: loop exit
PB: predicated region body
PF: predicated region fallthrough
CT: control target
= control target key end

     0   :  { %s1156_s15 = smov 0   ;;  %s1158_s16 = smov 0   ;;  %s1449_s0 = inlined_call_operand.vmem [shape: f32[128,128], index: 0, kind: input, shape index: {}]   ;;  %s1450_s1 = inlined_call_operand.vmem [shape: f32[128,128], index: 1, kind: input, shape index: {}]   ;;  %s1451_s2 = inlined_call_operand.vmem [shape: bf16[3,128,128], index: 2, kind: input, shape index: {}]   ;;  %s1452_s3 = inlined_call_operand.vmem [shape: bf16[3,128,128], index: 3, kind: input, shape index: {}]   ;;  %s1453_s4 = inlined_call_operand.vmem [shape: f32[128,128], index: 4, kind: output, shape index: {}]  }
   0x1   :  { %s1160_s17 = smov 0  }
   0x2 LB: > { %s23_s18 = sadd.s32 1, %s1125_s16  ;;  %p839_p0 = scmp.ge.s32.totalorder %s1129_s17, 1  ;;  %s1129_s17 = sphi %s1160_s17, %s14_s17   ;;  %s1125_s16 = sphi %s1158_s16, %s1455_s16   ;;  %s1121_s15 = sphi %s1156_s15, %s1454_s15  }
   0x3   : > { %p24_p1 = scmp.ge.s32.totalorder %s23_s18, 3  ;;  %p202_p2 = scmp.lt.s32.totalorder %s1129_s17, 4 }
   0x5   : > { %s1457_s18 = smov (%p24_p1, %s23_s18), 0  ;;  %p203_p3 = pnand %p839_p0, %p202_p2 }
   0x6   : > { %p249_p4 = scmp.lt.s32.totalorder (!%p203_p3), %s1121_s15, 2  ;;  %p844_p5 = scmp.ne.s32.totalorder (!%p203_p3), %s1121_s15, 0 }
   0x7   : > { %206 = sbr.rel (%p203_p3) target bundleno = 535 (0x217), region = 36 }
   0xe   : > { %s250_s19 = scalar_select %p249_p4, %s1121_s15, 2 }
   0xf   : > { %273 = sbr.rel (%p844_p5) target bundleno = 276 (0x114), region = 40  ;;  %v290_v0 = vld [vmem:[%s1450_s1] sm:$0xff] (!%p844_p5)  ;;  %v291_v1 = vld [vmem:[%s1450_s1 + $0x8] sm:$0xff] (!%p844_p5)  ;;  %v292_v2 = vld [vmem:[%s1450_s1 + $0x10] sm:$0xff] (!%p844_p5) }
  0x10   : > { %s865_s20 = sshll.u32 %s250_s19, 6  ;;  %v1003_v3 = vpack.c.bf16 (!%p844_p5), %v291_v1, %v290_v0  ;;  %v293_v4 = vld [vmem:[%s1450_s1 + $0x18] sm:$0xff] (!%p844_p5)  ;;  %v294_v6 = vld [vmem:[%s1450_s1 + $0x20] sm:$0xff] (!%p844_p5)  ;;  %v295_v7 = vld [vmem:[%s1450_s1 + $0x28] sm:$0xff] (!%p844_p5) }
  0x11   : > { %s1177_s23 = scalar_lea.vmem %s1451_s2, %s865_s20  ;;  %s1182_s26 = scalar_lea.vmem %s1452_s3, %s865_s20  ;;  %v1007_v5 = vpack.c.bf16 (!%p844_p5), %v293_v4, %v292_v2  ;;  %v1011_v8 = vpack.c.bf16 (!%p844_p5), %v295_v7, %v294_v6  ;;  %v274_v9 = vld [vmem:[%s1449_s0] sm:$0xff] (!%p844_p5)  ;;  %v296_v11 = vld [vmem:[%s1450_s1 + $0x30] sm:$0xff] (!%p844_p5)  ;;  %v297_v12 = vld [vmem:[%s1450_s1 + $0x38] sm:$0xff] (!%p844_p5) }
  0x12   : > { %1004 = vmatprep.subr.bf16.mxu0 (!%p844_p5), %v1003_v3  ;;  %1035 = vmatprep.subr.bf16.mxu1 (!%p844_p5), %v1003_v3  ;;  %v282_v10 = vld [vmem:[%s1449_s0 + $0x40] sm:$0xff] (!%p844_p5)  ;;  %v1015_v13 = vpack.c.bf16 (!%p844_p5), %v297_v12, %v296_v11  ;;  %v299_v15 = vld [vmem:[%s1450_s1 + $0x48] sm:$0xff] (!%p844_p5)  ;;  %v300_v17 = vld [vmem:[%s1450_s1 + $0x50] sm:$0xff] (!%p844_p5) }
  0x13   : > { %1006 = vmatpush3.bf16.msra.mxu0 (!%p844_p5), %v1003_v3  ;;  %1043 = vmatpush3.bf16.msra.mxu1 (!%p844_p5), %v1003_v3  ;;  %v298_v14 = vld [vmem:[%s1450_s1 + $0x40] sm:$0xff] (!%p844_p5)  ;;  %v301_v18 = vld [vmem:[%s1450_s1 + $0x58] sm:$0xff] (!%p844_p5)  ;;  %v303_v21 = vld [vmem:[%s1450_s1 + $0x68] sm:$0xff] (!%p844_p5) }
  0x14   : > { %1008 = vmatprep.subr.bf16.mxu0 (!%p844_p5), %v1007_v5  ;;  %1036 = vmatprep.subr.bf16.mxu1 (!%p844_p5), %v1007_v5  ;;  %v1019_v16 = vpack.c.bf16 (!%p844_p5), %v299_v15, %v298_v14  ;;  %v1023_v19 = vpack.c.bf16 (!%p844_p5), %v301_v18, %v300_v17  ;;  %v302_v20 = vld [vmem:[%s1450_s1 + $0x60] sm:$0xff] (!%p844_p5)  ;;  %v304_v23 = vld [vmem:[%s1450_s1 + $0x70] sm:$0xff] (!%p844_p5)  ;;  %v305_v24 = vld [vmem:[%s1450_s1 + $0x78] sm:$0xff] (!%p844_p5) }
  0x15   : > { %947 = vmatprep.mubr.f32.mxu0 (!%p844_p5), %v274_v9  ;;  %959 = vmatprep.mubr.f32.mxu1 (!%p844_p5), %v282_v10  ;;  %v1027_v22 = vpack.c.bf16 (!%p844_p5), %v303_v21, %v302_v20  ;;  %v1031_v25 = vpack.c.bf16 (!%p844_p5), %v305_v24, %v304_v23  ;;  %v275_v26 = vld [vmem:[%s1449_s0 + $0x8] sm:$0xff] (!%p844_p5)  ;;  %v276_v28 = vld [vmem:[%s1449_s0 + $0x10] sm:$0xff] (!%p844_p5)  ;;  %v277_v30 = vld [vmem:[%s1449_s0 + $0x18] sm:$0xff] (!%p844_p5) }
  0x16   : > { %v283_v27 = vld [vmem:[%s1449_s0 + $0x48] sm:$0xff]  ;;  %v284_v29 = vld [vmem:[%s1449_s0 + $0x50] sm:$0xff]  ;;  %v285_v31 = vld [vmem:[%s1449_s0 + $0x58] sm:$0xff] }
  0x17   : > { %1010 = vmatpush3.bf16.msra.mxu0 %v1007_v5  ;;  %1044 = vmatpush3.bf16.msra.mxu1 %v1007_v5  ;;  %v278_v32 = vld [vmem:[%s1449_s0 + $0x20] sm:$0xff]  ;;  %v279_v34 = vld [vmem:[%s1449_s0 + $0x28] sm:$0xff]  ;;  %v280_v36 = vld [vmem:[%s1449_s0 + $0x30] sm:$0xff] }
  0x18   : > { %1012 = vmatprep.subr.bf16.mxu0 %v1011_v8  ;;  %1037 = vmatprep.subr.bf16.mxu1 %v1011_v8  ;;  %v286_v33 = vld [vmem:[%s1449_s0 + $0x60] sm:$0xff]  ;;  %v287_v35 = vld [vmem:[%s1449_s0 + $0x68] sm:$0xff]  ;;  %v288_v37 = vld [vmem:[%s1449_s0 + $0x70] sm:$0xff] }
  0x19   : > { %v281_v38 = vld [vmem:[%s1449_s0 + $0x38] sm:$0xff] }
  0x1a   : > { %v289_v39 = vld [vmem:[%s1449_s0 + $0x78] sm:$0xff] }
  0x1b   : > { %1014 = vmatpush3.bf16.msra.mxu0 %v1011_v8  ;;  %1045 = vmatpush3.bf16.msra.mxu1 %v1011_v8 }
  0x1c   : > { %1016 = vmatprep.subr.bf16.mxu0 %v1015_v13  ;;  %1038 = vmatprep.subr.bf16.mxu1 %v1015_v13 }
  0x1f   : > { %1018 = vmatpush3.bf16.msra.mxu0 %v1015_v13  ;;  %1046 = vmatpush3.bf16.msra.mxu1 %v1015_v13 }
  0x20   : > { %1020 = vmatprep.subr.bf16.mxu0 %v1019_v16  ;;  %1039 = vmatprep.subr.bf16.mxu1 %v1019_v16 }
  0x23   : > { %1022 = vmatpush3.bf16.msra.mxu0 %v1019_v16  ;;  %1047 = vmatpush3.bf16.msra.mxu1 %v1019_v16 }
  0x24   : > { %1024 = vmatprep.subr.bf16.mxu0 %v1023_v19  ;;  %1040 = vmatprep.subr.bf16.mxu1 %v1023_v19 }
  0x27   : > { %1026 = vmatpush3.bf16.msra.mxu0 %v1023_v19  ;;  %1048 = vmatpush3.bf16.msra.mxu1 %v1023_v19 }
  0x28   : > { %1028 = vmatprep.subr.bf16.mxu0 %v1027_v22  ;;  %1041 = vmatprep.subr.bf16.mxu1 %v1027_v22 }
  0x2b   : > { %1030 = vmatpush3.bf16.msra.mxu0 %v1027_v22  ;;  %1049 = vmatpush3.bf16.msra.mxu1 %v1027_v22 }
  0x2c   : > { %1032 = vmatprep.subr.bf16.mxu0 %v1031_v25  ;;  %1042 = vmatprep.subr.bf16.mxu1 %v1031_v25 }
  0x2f   : > { %1034 = vmatpush3.bf16.msra.mxu0 %v1031_v25  ;;  %1050 = vmatpush3.bf16.msra.mxu1 %v1031_v25 }
  0x32   : > { %948 = vmatmul.mubr.f32.vlgmr.msra.gmra.mrb[0].mxu0 %v275_v26  ;;  %960 = vmatmul.mubr.f32.vlgmr.msra.gmra.mrb[0].mxu1 %v283_v27 }
  0x33   : > { %950 = vmatprep.mubr.f32.mxu0 %v276_v28  ;;  %962 = vmatprep.mubr.f32.mxu1 %v284_v29 }
  0x36   : > { %951 = vmatmul.mubr.f32.gmra.mrb[2].mxu0 %v277_v30  ;;  %963 = vmatmul.mubr.f32.gmra.mrb[2].mxu1 %v285_v31 }
  0x37   : > { %953 = vmatprep.mubr.f32.mxu0 %v278_v32  ;;  %965 = vmatprep.mubr.f32.mxu1 %v286_v33 }
  0x3a   : > { %954 = vmatmul.mubr.f32.gmra.mrb[4].mxu0 %v279_v34  ;;  %966 = vmatmul.mubr.f32.gmra.mrb[4].mxu1 %v287_v35 }
  0x3b   : > { %956 = vmatprep.mubr.f32.mxu0 %v280_v36  ;;  %968 = vmatprep.mubr.f32.mxu1 %v288_v37 }
  0x3e   : > { %957 = vmatmul.mubr.f32.gmra.mrb[6].mxu0 %v281_v38  ;;  %969 = vmatmul.mubr.f32.gmra.mrb[6].mxu1 %v289_v39 }
 0x105   : > { %v949_v40 = vpop.f32.mrb[0].mxu0  ;;  %v961_v41 = vpop.f32.mrb[0].mxu1 }
 0x106   : > { %452 = vst [vmem:[%s1453_s4 + $0x8] sm:$0xff] %v949_v40  ;;  %460 = vst [vmem:[%s1453_s4 + $0x48] sm:$0xff] %v961_v41  ;;  %v372_v42 = vpop.f32.mrb[1].mxu0  ;;  %v412_v43 = vpop.f32.mrb[1].mxu1 }
 0x107   : > { %451 = vst [vmem:[%s1453_s4] sm:$0xff] %v372_v42  ;;  %459 = vst [vmem:[%s1453_s4 + $0x40] sm:$0xff] %v412_v43 }
 0x109   : > { %v952_v44 = vpop.f32.mrb[2].mxu0  ;;  %v964_v45 = vpop.f32.mrb[2].mxu1 }
 0x10a   : > { %454 = vst [vmem:[%s1453_s4 + $0x18] sm:$0xff] %v952_v44  ;;  %462 = vst [vmem:[%s1453_s4 + $0x58] sm:$0xff] %v964_v45  ;;  %v382_v46 = vpop.f32.mrb[3].mxu0  ;;  %v422_v47 = vpop.f32.mrb[3].mxu1 }
 0x10b   : > { %453 = vst [vmem:[%s1453_s4 + $0x10] sm:$0xff] %v382_v46  ;;  %461 = vst [vmem:[%s1453_s4 + $0x50] sm:$0xff] %v422_v47 }
 0x10d   : > { %v955_v48 = vpop.f32.mrb[4].mxu0  ;;  %v967_v49 = vpop.f32.mrb[4].mxu1 }
 0x10e   : > { %456 = vst [vmem:[%s1453_s4 + $0x28] sm:$0xff] %v955_v48  ;;  %464 = vst [vmem:[%s1453_s4 + $0x68] sm:$0xff] %v967_v49  ;;  %v392_v50 = vpop.f32.mrb[5].mxu0  ;;  %v432_v51 = vpop.f32.mrb[5].mxu1 }
 0x10f   : > { %455 = vst [vmem:[%s1453_s4 + $0x20] sm:$0xff] %v392_v50  ;;  %463 = vst [vmem:[%s1453_s4 + $0x60] sm:$0xff] %v432_v51 }
 0x111   : > { %v958_v52 = vpop.f32.mrb[6].mxu0  ;;  %v970_v53 = vpop.f32.mrb[6].mxu1 }
 0x112   : > { %458 = vst [vmem:[%s1453_s4 + $0x38] sm:$0xff] %v958_v52  ;;  %466 = vst [vmem:[%s1453_s4 + $0x78] sm:$0xff] %v970_v53  ;;  %v402_v54 = vpop.f32.mrb[7].mxu0  ;;  %v442_v55 = vpop.f32.mrb[7].mxu1 }
 0x113   : > { %457 = vst [vmem:[%s1453_s4 + $0x30] sm:$0xff] %v402_v54  ;;  %465 = vst [vmem:[%s1453_s4 + $0x70] sm:$0xff] %v442_v55 }
 0x114 PF: > { %v1091_v56 = vld [vmem:[%s1182_s26] sm:$0xff]   ;;  %v1092_v57 = vld [vmem:[%s1182_s26 + $0x8] sm:$0xff]   ;;  %v1093_v58 = vld [vmem:[%s1182_s26 + $0x10] sm:$0xff]  }
 0x115   : > { %971 = vmatprep.subr.bf16.mxu0 %v1091_v56  ;;  %1051 = vmatprep.subr.bf16.mxu1 %v1091_v56  ;;  %v1094_v59 = vld [vmem:[%s1182_s26 + $0x18] sm:$0xff]   ;;  %v1099_v60 = vld [vmem:[%s1177_s23] sm:$0xff]   ;;  %v1096_v63 = vld [vmem:[%s1182_s26 + $0x28] sm:$0xff]  }
 0x116   : > { %972 = vmatpush3.bf16.msra.mxu0 %v1091_v56  ;;  %1059 = vmatpush3.bf16.msra.mxu1 %v1091_v56  ;;  %v1100_v61 = vld [vmem:[%s1177_s23 + $0x20] sm:$0xff]   ;;  %v1097_v0 = vld [vmem:[%s1182_s26 + $0x30] sm:$0xff]   ;;  %v1098_v1 = vld [vmem:[%s1182_s26 + $0x38] sm:$0xff]  }
 0x117   : > { %973 = vmatprep.subr.bf16.mxu0 %v1092_v57  ;;  %1052 = vmatprep.subr.bf16.mxu1 %v1092_v57  ;;  %v1095_v62 = vld [vmem:[%s1182_s26 + $0x20] sm:$0xff]   ;;  %v1101_v2 = vld [vmem:[%s1177_s23 + $0x8] sm:$0xff]   ;;  %v1103_v4 = vld [vmem:[%s1177_s23 + $0x10] sm:$0xff]  }
 0x118   : > { %987 = vmatprep.mubr.bf16.mxu0 %v1099_v60  ;;  %995 = vmatprep.mubr.bf16.mxu1 %v1100_v61  ;;  %v1102_v3 = vld [vmem:[%s1177_s23 + $0x28] sm:$0xff]   ;;  %v1104_v5 = vld [vmem:[%s1177_s23 + $0x30] sm:$0xff]   ;;  %v1105_v6 = vld [vmem:[%s1177_s23 + $0x18] sm:$0xff]  }
 0x119   : > { %v1106_v7 = vld [vmem:[%s1177_s23 + $0x38] sm:$0xff]   ;;  %v469_v8 = vld [vmem:[%s1453_s4 + $0x10] sm:$0xff]  ;;  %v467_v10 = vld [vmem:[%s1453_s4] sm:$0xff] }
 0x11a   : > { %974 = vmatpush3.bf16.msra.mxu0 %v1092_v57  ;;  %1060 = vmatpush3.bf16.msra.mxu1 %v1092_v57  ;;  %v477_v9 = vld [vmem:[%s1453_s4 + $0x50] sm:$0xff]  ;;  %v475_v11 = vld [vmem:[%s1453_s4 + $0x40] sm:$0xff]  ;;  %v470_v14 = vld [vmem:[%s1453_s4 + $0x18] sm:$0xff] }
 0x11b   : > { %975 = vmatprep.subr.bf16.mxu0 %v1093_v58  ;;  %1053 = vmatprep.subr.bf16.mxu1 %v1093_v58  ;;  %v478_v15 = vld [vmem:[%s1453_s4 + $0x58] sm:$0xff]  ;;  %v468_v20 = vld [vmem:[%s1453_s4 + $0x8] sm:$0xff]  ;;  %v473_v32 = vld [vmem:[%s1453_s4 + $0x30] sm:$0xff] }
 0x11c   : > { %v476_v21 = vld [vmem:[%s1453_s4 + $0x48] sm:$0xff]  ;;  %v481_v33 = vld [vmem:[%s1453_s4 + $0x70] sm:$0xff]  ;;  %v471_v34 = vld [vmem:[%s1453_s4 + $0x20] sm:$0xff] }
 0x11d   : > { %v479_v35 = vld [vmem:[%s1453_s4 + $0x60] sm:$0xff]  ;;  %v474_v38 = vld [vmem:[%s1453_s4 + $0x38] sm:$0xff]  ;;  %v472_v44 = vld [vmem:[%s1453_s4 + $0x28] sm:$0xff] }
 0x11e   : > { %976 = vmatpush3.bf16.msra.mxu0 %v1093_v58  ;;  %1061 = vmatpush3.bf16.msra.mxu1 %v1093_v58  ;;  %v482_v39 = vld [vmem:[%s1453_s4 + $0x78] sm:$0xff]  ;;  %v480_v45 = vld [vmem:[%s1453_s4 + $0x68] sm:$0xff] }
 0x11f   : > { %977 = vmatprep.subr.bf16.mxu0 %v1094_v59  ;;  %1054 = vmatprep.subr.bf16.mxu1 %v1094_v59 }
 0x122   : > { %978 = vmatpush3.bf16.msra.mxu0 %v1094_v59  ;;  %1062 = vmatpush3.bf16.msra.mxu1 %v1094_v59 }
 0x123   : > { %979 = vmatprep.subr.bf16.mxu0 %v1095_v62  ;;  %1055 = vmatprep.subr.bf16.mxu1 %v1095_v62 }
 0x126   : > { %980 = vmatpush3.bf16.msra.mxu0 %v1095_v62  ;;  %1063 = vmatpush3.bf16.msra.mxu1 %v1095_v62 }
 0x127   : > { %981 = vmatprep.subr.bf16.mxu0 %v1096_v63  ;;  %1056 = vmatprep.subr.bf16.mxu1 %v1096_v63 }
 0x12a   : > { %982 = vmatpush3.bf16.msra.mxu0 %v1096_v63  ;;  %1064 = vmatpush3.bf16.msra.mxu1 %v1096_v63 }
 0x12b   : > { %983 = vmatprep.subr.bf16.mxu0 %v1097_v0  ;;  %1057 = vmatprep.subr.bf16.mxu1 %v1097_v0 }
 0x12e   : > { %984 = vmatpush3.bf16.msra.mxu0 %v1097_v0  ;;  %1065 = vmatpush3.bf16.msra.mxu1 %v1097_v0 }
 0x12f   : > { %985 = vmatprep.subr.bf16.mxu0 %v1098_v1  ;;  %1058 = vmatprep.subr.bf16.mxu1 %v1098_v1 }
 0x132   : > { %986 = vmatpush3.bf16.msra.mxu0 %v1098_v1  ;;  %1066 = vmatpush3.bf16.msra.mxu1 %v1098_v1 }
 0x135   : > { %988 = vmatmul.mubr.bf16.vlgmr.msra.gmra.mrb[0].mxu0 %v1101_v2  ;;  %996 = vmatmul.mubr.bf16.vlgmr.msra.gmra.mrb[0].mxu1 %v1102_v3 }
 0x136   : > { %991 = vmatprep.mubr.bf16.mxu0 %v1103_v4  ;;  %999 = vmatprep.mubr.bf16.mxu1 %v1104_v5 }
 0x13d   : > { %992 = vmatmul.mubr.bf16.gmra.mrb[4].mxu0 %v1105_v6  ;;  %1000 = vmatmul.mubr.bf16.gmra.mrb[4].mxu1 %v1106_v7 }
 0x208   : > { %v989_v12 = vpop.f32.mrb[0].mxu0  ;;  %v997_v13 = vpop.f32.mrb[0].mxu1 }
 0x209   : > { %v710_v16 = vadd.f32 %v989_v12, %v469_v8  ;;  %v718_v17 = vadd.f32 %v997_v13, %v477_v9  ;;  %v645_v18 = vpop.f32.mrb[1].mxu0  ;;  %v677_v19 = vpop.f32.mrb[1].mxu1 }
 0x20a   : > { %v708_v22 = vadd.f32 %v645_v18, %v467_v10  ;;  %v716_v23 = vadd.f32 %v677_v19, %v475_v11  ;;  %v990_v24 = vpop.f32.mrb[2].mxu0  ;;  %v998_v25 = vpop.f32.mrb[2].mxu1 }
 0x20b   : > { %726 = vst [vmem:[%s1453_s4 + $0x10] sm:$0xff] %v710_v16  ;;  %734 = vst [vmem:[%s1453_s4 + $0x50] sm:$0xff] %v718_v17  ;;  %v711_v26 = vadd.f32 %v990_v24, %v470_v14  ;;  %v719_v27 = vadd.f32 %v998_v25, %v478_v15  ;;  %v648_v28 = vpop.f32.mrb[3].mxu0  ;;  %v680_v29 = vpop.f32.mrb[3].mxu1 }
 0x20c   : > { %724 = vst [vmem:[%s1453_s4] sm:$0xff] %v708_v22  ;;  %732 = vst [vmem:[%s1453_s4 + $0x40] sm:$0xff] %v716_v23  ;;  %v709_v30 = vadd.f32 %v648_v28, %v468_v20  ;;  %v717_v31 = vadd.f32 %v680_v29, %v476_v21 }
 0x20d   : > { %727 = vst [vmem:[%s1453_s4 + $0x18] sm:$0xff] %v711_v26  ;;  %735 = vst [vmem:[%s1453_s4 + $0x58] sm:$0xff] %v719_v27 }
 0x20e   : > { %725 = vst [vmem:[%s1453_s4 + $0x8] sm:$0xff] %v709_v30  ;;  %733 = vst [vmem:[%s1453_s4 + $0x48] sm:$0xff] %v717_v31 }
 0x210   : > { %v993_v36 = vpop.f32.mrb[4].mxu0  ;;  %v1001_v37 = vpop.f32.mrb[4].mxu1 }
 0x211   : > { %v714_v40 = vadd.f32 %v993_v36, %v473_v32  ;;  %v722_v41 = vadd.f32 %v1001_v37, %v481_v33  ;;  %v661_v42 = vpop.f32.mrb[5].mxu0  ;;  %v693_v43 = vpop.f32.mrb[5].mxu1 }
 0x212   : > { %v712_v46 = vadd.f32 %v661_v42, %v471_v34  ;;  %v720_v47 = vadd.f32 %v693_v43, %v479_v35  ;;  %v994_v48 = vpop.f32.mrb[6].mxu0  ;;  %v1002_v49 = vpop.f32.mrb[6].mxu1 }
 0x213   : > { %730 = vst [vmem:[%s1453_s4 + $0x30] sm:$0xff] %v714_v40  ;;  %738 = vst [vmem:[%s1453_s4 + $0x70] sm:$0xff] %v722_v41  ;;  %v715_v50 = vadd.f32 %v994_v48, %v474_v38  ;;  %v723_v51 = vadd.f32 %v1002_v49, %v482_v39  ;;  %v664_v52 = vpop.f32.mrb[7].mxu0  ;;  %v696_v53 = vpop.f32.mrb[7].mxu1 }
 0x214   : > { %728 = vst [vmem:[%s1453_s4 + $0x20] sm:$0xff] %v712_v46  ;;  %736 = vst [vmem:[%s1453_s4 + $0x60] sm:$0xff] %v720_v47  ;;  %v713_v54 = vadd.f32 %v664_v52, %v472_v44  ;;  %v721_v55 = vadd.f32 %v696_v53, %v480_v45 }
 0x215   : > { %731 = vst [vmem:[%s1453_s4 + $0x38] sm:$0xff] %v715_v50  ;;  %739 = vst [vmem:[%s1453_s4 + $0x78] sm:$0xff] %v723_v51 }
 0x216   : > { %729 = vst [vmem:[%s1453_s4 + $0x28] sm:$0xff] %v713_v54  ;;  %737 = vst [vmem:[%s1453_s4 + $0x68] sm:$0xff] %v721_v55 }
 0x217 PF: > { %s14_s17 = sadd.s32 1, %s1129_s17   ;;  %s1454_s15 = smov %s1125_s16 }
 0x218   : > { %p11_p6 = scmp.ge.s32.totalorder %s14_s17, 5   ;;  %s1455_s16 = smov %s1457_s18 }
 0x21a   :  { %13 = sbr.rel (!%p11_p6) target bundleno = 2 (0x2), region = 76 }

</bundles_post_ra>
